<compile_context>
chip_gen: v7x
topology: tpu7x:2x2x1
jax: 0.10.0
libtpu: 0.0.40
codegen_flags: <defaults>
</compile_context>

<pallas_src>
import jax
import jax.numpy as jnp
from jax import lax
from jax.experimental import pallas as pl
from jax.experimental.pallas import tpu as pltpu

# ---------------- config (small synthetic sizes) ----------------
B = 2            # batch
T = 8            # text sequence length
HH, WW = 4, 4    # backbone feature-map spatial dims
S = HH * WW      # number of image tokens
C_IMG = 64       # backbone channel dim (stand-in for resnet50's 2048)
H = 32           # text hidden dim (stand-in for BERT's 768)
NUM_HEADS = 8
HEAD_DIM = H // NUM_HEADS
CLS_HID = 512
NUM_CLASSES = 2
LN_EPS = 1e-5
SCALE = 1.0 / (HEAD_DIM ** 0.5)
LANES = 128

# ---- activation slab row offsets (one fused input DMA) ----
A_TEXT = 0                   # rows 0:B,        lanes 0:H            : CLS text feats
A_IMG = 8                    # rows 8:8+B*S,    lanes 0:C_IMG        : image tokens
                             #                  lanes C_IMG:C_IMG+NH : mask bias
ACT_ROWS = A_IMG + B * S     # 40

# ---- attention parameter slab offsets (lane-dense, all row starts 8-aligned) ----
R_WQKV = 0                   # rows 0:C_IMG, lanes 0:3H : wq_pad | wp@wk | wp@wv
R_WO = C_IMG                 # rows 64:96,   lanes 0:H  : attention_output weight
R_E = R_WO + H               # rows 96:104,  lanes 0:H  : block-diag head selector
R_BIAS = R_E + 8             # row 104: lanes [0:H]=bq [H:2H]=bpk [2H:3H]=bpv [3H:4H]=bo
R_LN = R_BIAS + 8            # row 112: lanes [0:H]=ln_gamma [H:2H]=ln_beta
ATTN_ROWS = R_LN + 8         # 120

# ---- classifier parameter slab offsets ----
R_W1 = 0                     # [H, CLS_HID]
R_B1 = R_W1 + H              # [1, CLS_HID]
R_W2T = R_B1 + 8             # [NUM_CLASSES, CLS_HID]  (w2 transposed)
R_B2 = R_W2T + 8             # b2 in first NUM_CLASSES lanes of one row
CLS_ROWS = R_B2 + 8          # 56


# ---------------- Pallas kernel (single invocation, whole batch) ----------------
def cross_attention_fusion_kernel(act_ref, wslab_ref, cslab_ref, out_ref):
  f32, bf16 = jnp.float32, jnp.bfloat16

  act = act_ref[...]                                           # [ACT_ROWS, 128] f32
  text = act[:B, :H]                                           # [B, H] CLS text feats
  mbias = act[A_IMG:A_IMG + B * S, C_IMG:C_IMG + NUM_HEADS]    # [B*S, NH] mask bias

  # ---- fused Q/K/V projection: one bf16 MXU pass + one bias-row add ----
  # (1x1-conv image projection folded into K/V weights, 1/sqrt(hd) folded into Q)
  proj_in = act[:, :C_IMG].astype(bf16)                        # [ACT_ROWS, C_IMG]
  wqkv = wslab_ref[R_WQKV:R_WQKV + C_IMG, :].astype(bf16)      # [C_IMG, 128]
  bias_row = wslab_ref[R_BIAS:R_BIAS + 1, :]                   # [1, 128] f32
  qkv = jnp.dot(proj_in, wqkv, preferred_element_type=f32) + bias_row

  q = qkv[:B, 0:H]                                             # [B, H]
  kv = qkv[A_IMG:A_IMG + B * S, :]                             # [B*S, 128]
  k3 = kv[:, H:2 * H].reshape(B, S, H)                         # [B, S, H]
  v3 = kv[:, 2 * H:3 * H].reshape(B, S, H)                     # [B, S, H]

  # ---- per-head scores via block-diagonal head-selector matrix E ----
  #   scores[b, s, n] = sum_{j in head n} q[b, j] * k[b, s, j]
  e_sel = wslab_ref[R_E:R_E + NUM_HEADS, 0:H].astype(bf16)     # [NH, H]
  qk = (k3 * q[:, None, :]).reshape(B * S, H)                  # [B*S, H] f32
  scores2 = lax.dot_general(qk.astype(bf16), e_sel,
                            (((1,), (1,)), ((), ())),
                            preferred_element_type=f32)        # [B*S, NH]
  scores = (scores2 + mbias).reshape(B, S, NUM_HEADS)          # additive mask bias

  # softmax over image tokens (axis=1); denominator reciprocal on the EUP
  m = jnp.max(scores, axis=1, keepdims=True)
  p = jnp.exp(scores - m)
  denom = jnp.sum(p, axis=1, keepdims=True)
  p = p * pl.reciprocal(denom, approx=True)                    # [B, S, NH]

  # context: expand per-head probabilities back to channels, weight the values
  pe = jnp.dot(p.reshape(B * S, NUM_HEADS).astype(bf16), e_sel,
               preferred_element_type=f32).reshape(B, S, H)    # [B, S, H]
  ctx = jnp.sum(pe * v3, axis=1)                               # [B, H]

  # ---- output projection + (dropout=identity) + residual + LayerNorm1 (CLS row) ----
  wo = wslab_ref[R_WO:R_WO + H, 0:H].astype(bf16)              # [H, H]
  bo = bias_row[:, 3 * H:4 * H]                                # [1, H]
  ln_row = wslab_ref[R_LN:R_LN + 1, :]                         # [1, 128]
  ln_g = ln_row[:, 0:H]
  ln_b = ln_row[:, H:2 * H]

  attn_out = jnp.dot(ctx.astype(bf16), wo, preferred_element_type=f32) + bo
  x = attn_out + text
  mean = jnp.mean(x, axis=-1, keepdims=True)
  var = jnp.mean((x - mean) ** 2, axis=-1, keepdims=True)
  y = (x - mean) * lax.rsqrt(var + LN_EPS) * ln_g + ln_b       # [B, H]

  # ---- classifier MLP ----
  w1 = cslab_ref[R_W1:R_W1 + H, :].astype(bf16)                # [H, 512]
  b1 = cslab_ref[R_B1:R_B1 + 1, :]                             # [1, 512]
  w2t = cslab_ref[R_W2T:R_W2T + NUM_CLASSES, :].astype(bf16)   # [2, 512]
  b2 = cslab_ref[R_B2:R_B2 + 1, 0:NUM_CLASSES]                 # [1, 2]

  h1 = jnp.maximum(jnp.dot(y.astype(bf16), w1, preferred_element_type=f32) + b1, 0.0)
  logits = lax.dot_general(h1.astype(bf16), w2t, (((1,), (1,)), ((), ())),
                           preferred_element_type=f32) + b2    # [B, 2]
  out_ref[...] = logits


# ---------------- wrapper ----------------
def cross_attention_fusion(text_features, img_feature_maps, img_mask, params):
  f32 = jnp.float32
  Bx, C, hh, ww = img_feature_maps.shape
  Sx = hh * ww
  assert (Bx, C, Sx) == (B, C_IMG, S)

  # NCHW -> [B*S, C] image tokens (matches permute(0,2,3,1).reshape)
  img_tokens = jnp.transpose(img_feature_maps, (0, 2, 3, 1)).reshape(Bx * Sx, C)
  # only the CLS row feeds the classifier; attention rows are independent
  text_cls = text_features[:, 0, :]                            # [B, H]
  # additive attention-mask bias, pre-broadcast to one lane per head
  mask_bias = jnp.where(img_mask == 0, -10000.0, 0.0).astype(f32)
  mask_bias = jnp.broadcast_to(mask_bias.reshape(Bx * Sx, 1), (Bx * Sx, NUM_HEADS))

  # ---- activation slab: text rows + image-token rows + mask lanes (one DMA) ----
  act_slab = jnp.zeros((ACT_ROWS, LANES), f32)
  act_slab = act_slab.at[:Bx, :H].set(text_cls)
  act_slab = act_slab.at[A_IMG:A_IMG + Bx * Sx, :C_IMG].set(img_tokens)
  act_slab = act_slab.at[A_IMG:A_IMG + Bx * Sx, C_IMG:C_IMG + NUM_HEADS].set(mask_bias)

  # ---- attention parameter slab (lane-dense [120, 128]) ----
  # fold 1x1-conv projection into K/V weights; fold 1/sqrt(hd) into Q weights
  wq = params["wq"] * SCALE
  bq = params["bq"] * SCALE
  wpk = params["wp"] @ params["wk"]
  bpk = params["bp"] @ params["wk"] + params["bk"]
  wpv = params["wp"] @ params["wv"]
  bpv = params["bp"] @ params["wv"] + params["bv"]
  # block-diagonal head selector E[n, j] = 1 iff channel j belongs to head n
  head_sel = (jnp.arange(H)[None, :] // HEAD_DIM ==
              jnp.arange(NUM_HEADS)[:, None]).astype(f32)      # [NH, H]

  wslab = jnp.zeros((ATTN_ROWS, LANES), f32)
  wslab = wslab.at[:H, 0:H].set(wq)                            # wq (rows H:C_IMG zero)
  wslab = wslab.at[:C_IMG, H:2 * H].set(wpk)
  wslab = wslab.at[:C_IMG, 2 * H:3 * H].set(wpv)
  wslab = wslab.at[R_WO:R_WO + H, 0:H].set(params["wo"])
  wslab = wslab.at[R_E:R_E + NUM_HEADS, 0:H].set(head_sel)
  wslab = wslab.at[R_BIAS, 0:H].set(bq[0])
  wslab = wslab.at[R_BIAS, H:2 * H].set(bpk[0])
  wslab = wslab.at[R_BIAS, 2 * H:3 * H].set(bpv[0])
  wslab = wslab.at[R_BIAS, 3 * H:4 * H].set(params["bo"][0])
  wslab = wslab.at[R_LN, 0:H].set(params["ln_g"][0])
  wslab = wslab.at[R_LN, H:2 * H].set(params["ln_b"][0])

  # ---- classifier parameter slab (already lane-dense, 512 lanes) ----
  def pad8(rows):  # pad a [r, W] block up to 8 rows (keeps offsets 8-aligned)
    return jnp.concatenate(
        [rows, jnp.zeros((8 - rows.shape[0], rows.shape[1]), f32)], axis=0)

  b2_row = jnp.zeros((1, CLS_HID), f32).at[:, :NUM_CLASSES].set(params["b2"])
  cls_slab = jnp.concatenate([
      params["w1"], pad8(params["b1"]),
      pad8(params["w2"].T), pad8(b2_row),
  ], axis=0)                                                   # [CLS_ROWS, 512]

  # grid-less call: single kernel invocation, whole arrays resident in VMEM
  return pl.pallas_call(
      cross_attention_fusion_kernel,
      out_shape=jax.ShapeDtypeStruct((Bx, NUM_CLASSES), jnp.float32),
      in_specs=[
          pl.BlockSpec(memory_space=pltpu.MemorySpace.VMEM),   # activation slab
          pl.BlockSpec(memory_space=pltpu.MemorySpace.VMEM),   # attention param slab
          pl.BlockSpec(memory_space=pltpu.MemorySpace.VMEM),   # classifier param slab
      ],
      out_specs=pl.BlockSpec(memory_space=pltpu.MemorySpace.VMEM),
  )(act_slab, wslab, cls_slab)


# ---------------- deterministic parameter init (matches _init_weights) ----------------
def init_params(key):
  ks = jax.random.split(key, 8)
  std = 0.02
  p = {}
  p["wp"] = std * jax.random.normal(ks[0], (C_IMG, H), jnp.float32)      # 1x1 conv weight
  p["bp"] = jnp.zeros((1, H), jnp.float32)
  p["wq"] = std * jax.random.normal(ks[1], (H, H), jnp.float32)          # text_query
  p["bq"] = jnp.zeros((1, H), jnp.float32)
  p["wk"] = std * jax.random.normal(ks[2], (H, H), jnp.float32)          # img_key
  p["bk"] = jnp.zeros((1, H), jnp.float32)
  p["wv"] = std * jax.random.normal(ks[3], (H, H), jnp.float32)          # img_value
  p["bv"] = jnp.zeros((1, H), jnp.float32)
  p["wo"] = std * jax.random.normal(ks[4], (H, H), jnp.float32)          # attention_output
  p["bo"] = jnp.zeros((1, H), jnp.float32)
  p["ln_g"] = jnp.ones((1, H), jnp.float32)                              # layer_norm1
  p["ln_b"] = jnp.zeros((1, H), jnp.float32)
  p["w1"] = std * jax.random.normal(ks[5], (H, CLS_HID), jnp.float32)    # classifier[0]
  p["b1"] = jnp.zeros((1, CLS_HID), jnp.float32)
  p["w2"] = std * jax.random.normal(ks[6], (CLS_HID, NUM_CLASSES), jnp.float32)  # classifier[3]
  p["b2"] = jnp.zeros((1, NUM_CLASSES), jnp.float32)
  return p


# ---------------- pure-JAX reference (for correctness check) ----------------
def reference(text, img_nchw, mask, p):
  Bx, C, hh, ww = img_nchw.shape
  img = jnp.transpose(img_nchw, (0, 2, 3, 1)).reshape(Bx, hh * ww, C)
  img_tok = img @ p["wp"] + p["bp"]
  q = text @ p["wq"] + p["bq"]
  k = img_tok @ p["wk"] + p["bk"]
  v = img_tok @ p["wv"] + p["bv"]

  def split(x):
    return x.reshape(Bx, -1, NUM_HEADS, HEAD_DIM).transpose(0, 2, 1, 3)

  qh, kh, vh = split(q), split(k), split(v)
  scores = jnp.einsum("bhtd,bhsd->bhts", qh, kh) / (HEAD_DIM ** 0.5)
  m = mask[:, None, None, :]
  scores = jnp.where(m == 0, -10000.0, scores)
  probs = jax.nn.softmax(scores, axis=-1)
  ctx = jnp.einsum("bhts,bhsd->bhtd", probs, vh).transpose(0, 2, 1, 3).reshape(Bx, -1, H)
  attn_out = ctx @ p["wo"] + p["bo"]
  x = attn_out + text
  mean = x.mean(-1, keepdims=True)
  var = ((x - mean) ** 2).mean(-1, keepdims=True)
  y = (x - mean) / jnp.sqrt(var + LN_EPS) * p["ln_g"] + p["ln_b"]
  pooled = y[:, 0]
  h1 = jax.nn.relu(pooled @ p["w1"] + p["b1"])
  return h1 @ p["w2"] + p["b2"]


if __name__ == "__main__":
  key = jax.random.PRNGKey(0)
  k_text, k_img, k_par = jax.random.split(key, 3)

  # Synthetic backbone outputs (stand-ins for BERT / ResNet50 features).
  text_features = jax.random.normal(k_text, (B, T, H), jnp.float32)
  img_feature_maps = jax.random.normal(k_img, (B, C_IMG, HH, WW), jnp.float32)  # NCHW
  img_mask = jnp.ones((B, S), jnp.float32)

  params = init_params(k_par)

  logits = cross_attention_fusion(text_features, img_feature_maps, img_mask, params)
  logits = jax.block_until_ready(logits)

  ref = reference(text_features, img_feature_maps, img_mask, params)
  assert logits.shape == (B, NUM_CLASSES)
  assert jnp.allclose(logits, ref, atol=2e-3, rtol=2e-3), (logits, ref)
  print("KERNEL_OK")
</pallas_src>

<mosaic_0001>
module attributes {stable_mosaic.version = 11 : i64} {
  func.func @cross_attention_fusion_kernel(%arg0: memref<40x128xf32, #tpu.memory_space<vmem>>, %arg1: memref<120x128xf32, #tpu.memory_space<vmem>>, %arg2: memref<56x512xf32, #tpu.memory_space<vmem>>, %arg3: memref<2x2xf32, #tpu.memory_space<vmem>>) attributes {dimension_semantics = [], scalar_prefetch = 0 : i64, scratch_operands = 0 : i64, tpu.core_type = #tpu.core_type<tc>} {
    %c0 = arith.constant 0 : index
    %c0_0 = arith.constant 0 : index
    %0 = vector.load %arg0[%c0, %c0_0] : memref<40x128xf32, #tpu.memory_space<vmem>>, vector<40x128xf32>
    %1 = vector.extract_strided_slice %0 {offsets = [0, 0], sizes = [2, 32], strides = [1, 1]} : vector<40x128xf32> to vector<2x32xf32>
    %2 = vector.extract_strided_slice %0 {offsets = [8, 64], sizes = [32, 8], strides = [1, 1]} : vector<40x128xf32> to vector<32x8xf32>
    %3 = vector.extract_strided_slice %0 {offsets = [0, 0], sizes = [40, 64], strides = [1, 1]} : vector<40x128xf32> to vector<40x64xf32>
    %4 = arith.truncf %3 : vector<40x64xf32> to vector<40x64xbf16>
    %c0_1 = arith.constant 0 : index
    %c0_2 = arith.constant 0 : index
    %5 = vector.load %arg1[%c0_1, %c0_2] : memref<120x128xf32, #tpu.memory_space<vmem>>, vector<64x128xf32>
    %6 = arith.truncf %5 : vector<64x128xf32> to vector<64x128xbf16>
    %c104 = arith.constant 104 : index
    %c0_3 = arith.constant 0 : index
    %7 = vector.load %arg1[%c104, %c0_3] : memref<120x128xf32, #tpu.memory_space<vmem>>, vector<1x128xf32>
    %cst = arith.constant dense<0.000000e+00> : vector<40x128xf32>
    %8 = tpu.matmul %4, %6, %cst {dimension_numbers = #tpu.dot_dimension_numbers<[1], [0], [0], [1], [0, 0, 1, 1], [], []>} : vector<40x64xbf16>, vector<64x128xbf16>, vector<40x128xf32> -> vector<40x128xf32>
    %9 = vector.broadcast %7 : vector<1x128xf32> to vector<40x128xf32>
    %10 = arith.addf %8, %9 : vector<40x128xf32>
    %11 = vector.extract_strided_slice %10 {offsets = [0, 0], sizes = [2, 32], strides = [1, 1]} : vector<40x128xf32> to vector<2x32xf32>
    %12 = vector.extract_strided_slice %10 {offsets = [8, 0], sizes = [32, 128], strides = [1, 1]} : vector<40x128xf32> to vector<32x128xf32>
    %13 = vector.extract_strided_slice %12 {offsets = [0, 32], sizes = [32, 32], strides = [1, 1]} : vector<32x128xf32> to vector<32x32xf32>
    %14 = vector.shape_cast %13 : vector<32x32xf32> to vector<2x16x32xf32>
    %15 = vector.extract_strided_slice %12 {offsets = [0, 64], sizes = [32, 32], strides = [1, 1]} : vector<32x128xf32> to vector<32x32xf32>
    %16 = vector.shape_cast %15 : vector<32x32xf32> to vector<2x16x32xf32>
    %c96 = arith.constant 96 : index
    %c0_4 = arith.constant 0 : index
    %17 = vector.load %arg1[%c96, %c0_4] : memref<120x128xf32, #tpu.memory_space<vmem>>, vector<8x32xf32>
    %18 = arith.truncf %17 : vector<8x32xf32> to vector<8x32xbf16>
    %19 = vector.shape_cast %11 : vector<2x32xf32> to vector<2x1x32xf32>
    %20 = vector.broadcast %19 : vector<2x1x32xf32> to vector<2x16x32xf32>
    %21 = arith.mulf %14, %20 : vector<2x16x32xf32>
    %22 = vector.shape_cast %21 : vector<2x16x32xf32> to vector<32x32xf32>
    %23 = arith.truncf %22 : vector<32x32xf32> to vector<32x32xbf16>
    %cst_5 = arith.constant dense<0.000000e+00> : vector<32x8xf32>
    %24 = tpu.matmul %23, %18, %cst_5 {dimension_numbers = #tpu.dot_dimension_numbers<[1], [1], [0], [0], [0, 0, 1, 0], [], []>} : vector<32x32xbf16>, vector<8x32xbf16>, vector<32x8xf32> -> vector<32x8xf32>
    %25 = arith.addf %24, %2 : vector<32x8xf32>
    %26 = vector.shape_cast %25 : vector<32x8xf32> to vector<2x16x8xf32>
    %cst_6 = arith.constant dense<0xFF800000> : vector<2x8xf32>
    %27 = vector.multi_reduction <maximumf>, %26, %cst_6 [1] : vector<2x16x8xf32> to vector<2x8xf32>
    %28 = vector.shape_cast %27 : vector<2x8xf32> to vector<2x1x8xf32>
    %29 = vector.broadcast %28 : vector<2x1x8xf32> to vector<2x16x8xf32>
    %30 = arith.subf %26, %29 : vector<2x16x8xf32>
    %31 = math.exp %30 : vector<2x16x8xf32>
    %cst_7 = arith.constant dense<0.000000e+00> : vector<2x8xf32>
    %32 = vector.multi_reduction <add>, %31, %cst_7 [1] : vector<2x16x8xf32> to vector<2x8xf32>
    %33 = vector.shape_cast %32 : vector<2x8xf32> to vector<2x1x8xf32>
    %34 = tpu.reciprocal %33 {approx = true} : vector<2x1x8xf32> -> vector<2x1x8xf32>
    %35 = vector.broadcast %34 : vector<2x1x8xf32> to vector<2x16x8xf32>
    %36 = arith.mulf %31, %35 : vector<2x16x8xf32>
    %37 = vector.shape_cast %36 : vector<2x16x8xf32> to vector<32x8xf32>
    %38 = arith.truncf %37 : vector<32x8xf32> to vector<32x8xbf16>
    %cst_8 = arith.constant dense<0.000000e+00> : vector<32x32xf32>
    %39 = tpu.matmul %38, %18, %cst_8 {dimension_numbers = #tpu.dot_dimension_numbers<[1], [0], [0], [1], [0, 0, 1, 1], [], []>} : vector<32x8xbf16>, vector<8x32xbf16>, vector<32x32xf32> -> vector<32x32xf32>
    %40 = vector.shape_cast %39 : vector<32x32xf32> to vector<2x16x32xf32>
    %41 = arith.mulf %40, %16 : vector<2x16x32xf32>
    %cst_9 = arith.constant dense<0.000000e+00> : vector<2x32xf32>
    %42 = vector.multi_reduction <add>, %41, %cst_9 [1] : vector<2x16x32xf32> to vector<2x32xf32>
    %c64 = arith.constant 64 : index
    %c0_10 = arith.constant 0 : index
    %43 = vector.load %arg1[%c64, %c0_10] : memref<120x128xf32, #tpu.memory_space<vmem>>, vector<32x32xf32>
    %44 = arith.truncf %43 : vector<32x32xf32> to vector<32x32xbf16>
    %45 = vector.extract_strided_slice %7 {offsets = [0, 96], sizes = [1, 32], strides = [1, 1]} : vector<1x128xf32> to vector<1x32xf32>
    %c112 = arith.constant 112 : index
    %c0_11 = arith.constant 0 : index
    %46 = vector.load %arg1[%c112, %c0_11] : memref<120x128xf32, #tpu.memory_space<vmem>>, vector<1x128xf32>
    %47 = vector.extract_strided_slice %46 {offsets = [0, 0], sizes = [1, 32], strides = [1, 1]} : vector<1x128xf32> to vector<1x32xf32>
    %48 = vector.extract_strided_slice %46 {offsets = [0, 32], sizes = [1, 32], strides = [1, 1]} : vector<1x128xf32> to vector<1x32xf32>
    %49 = arith.truncf %42 : vector<2x32xf32> to vector<2x32xbf16>
    %cst_12 = arith.constant dense<0.000000e+00> : vector<2x32xf32>
    %50 = tpu.matmul %49, %44, %cst_12 {dimension_numbers = #tpu.dot_dimension_numbers<[1], [0], [0], [1], [0, 0, 1, 1], [], []>} : vector<2x32xbf16>, vector<32x32xbf16>, vector<2x32xf32> -> vector<2x32xf32>
    %51 = vector.broadcast %45 : vector<1x32xf32> to vector<2x32xf32>
    %52 = arith.addf %50, %51 : vector<2x32xf32>
    %53 = arith.addf %52, %1 : vector<2x32xf32>
    %cst_13 = arith.constant dense<0.000000e+00> : vector<2xf32>
    %54 = vector.multi_reduction <add>, %53, %cst_13 [1] : vector<2x32xf32> to vector<2xf32>
    %55 = vector.shape_cast %54 : vector<2xf32> to vector<2x1xf32>
    %cst_14 = arith.constant 3.200000e+01 : f32
    %56 = vector.broadcast %cst_14 : f32 to vector<2x1xf32>
    %57 = arith.divf %55, %56 : vector<2x1xf32>
    %58 = vector.broadcast %57 : vector<2x1xf32> to vector<2x32xf32>
    %59 = arith.subf %53, %58 : vector<2x32xf32>
    %60 = arith.mulf %59, %59 : vector<2x32xf32>
    %cst_15 = arith.constant dense<0.000000e+00> : vector<2xf32>
    %61 = vector.multi_reduction <add>, %60, %cst_15 [1] : vector<2x32xf32> to vector<2xf32>
    %62 = vector.shape_cast %61 : vector<2xf32> to vector<2x1xf32>
    %cst_16 = arith.constant 3.200000e+01 : f32
    %63 = vector.broadcast %cst_16 : f32 to vector<2x1xf32>
    %64 = arith.divf %62, %63 : vector<2x1xf32>
    %65 = vector.broadcast %57 : vector<2x1xf32> to vector<2x32xf32>
    %66 = arith.subf %53, %65 : vector<2x32xf32>
    %cst_17 = arith.constant 9.99999974E-6 : f32
    %67 = vector.broadcast %cst_17 : f32 to vector<2x1xf32>
    %68 = arith.addf %64, %67 : vector<2x1xf32>
    %69 = math.rsqrt %68 : vector<2x1xf32>
    %70 = vector.broadcast %69 : vector<2x1xf32> to vector<2x32xf32>
    %71 = arith.mulf %66, %70 : vector<2x32xf32>
    %72 = vector.broadcast %47 : vector<1x32xf32> to vector<2x32xf32>
    %73 = arith.mulf %71, %72 : vector<2x32xf32>
    %74 = vector.broadcast %48 : vector<1x32xf32> to vector<2x32xf32>
    %75 = arith.addf %73, %74 : vector<2x32xf32>
    %c0_18 = arith.constant 0 : index
    %c0_19 = arith.constant 0 : index
    %76 = vector.load %arg2[%c0_18, %c0_19] : memref<56x512xf32, #tpu.memory_space<vmem>>, vector<32x512xf32>
    %77 = arith.truncf %76 : vector<32x512xf32> to vector<32x512xbf16>
    %c32 = arith.constant 32 : index
    %c0_20 = arith.constant 0 : index
    %78 = vector.load %arg2[%c32, %c0_20] : memref<56x512xf32, #tpu.memory_space<vmem>>, vector<1x512xf32>
    %c40 = arith.constant 40 : index
    %c0_21 = arith.constant 0 : index
    %79 = vector.load %arg2[%c40, %c0_21] : memref<56x512xf32, #tpu.memory_space<vmem>>, vector<2x512xf32>
    %80 = arith.truncf %79 : vector<2x512xf32> to vector<2x512xbf16>
    %c48 = arith.constant 48 : index
    %c0_22 = arith.constant 0 : index
    %81 = vector.load %arg2[%c48, %c0_22] : memref<56x512xf32, #tpu.memory_space<vmem>>, vector<1x2xf32>
    %82 = arith.truncf %75 : vector<2x32xf32> to vector<2x32xbf16>
    %cst_23 = arith.constant dense<0.000000e+00> : vector<2x512xf32>
    %83 = tpu.matmul %82, %77, %cst_23 {dimension_numbers = #tpu.dot_dimension_numbers<[1], [0], [0], [1], [0, 0, 1, 1], [], []>} : vector<2x32xbf16>, vector<32x512xbf16>, vector<2x512xf32> -> vector<2x512xf32>
    %84 = vector.broadcast %78 : vector<1x512xf32> to vector<2x512xf32>
    %85 = arith.addf %83, %84 : vector<2x512xf32>
    %cst_24 = arith.constant 0.000000e+00 : f32
    %86 = vector.broadcast %cst_24 : f32 to vector<2x512xf32>
    %87 = arith.maximumf %85, %86 : vector<2x512xf32>
    %88 = arith.truncf %87 : vector<2x512xf32> to vector<2x512xbf16>
    %cst_25 = arith.constant dense<0.000000e+00> : vector<2x2xf32>
    %89 = tpu.matmul %88, %80, %cst_25 {dimension_numbers = #tpu.dot_dimension_numbers<[1], [1], [0], [0], [0, 0, 1, 0], [], []>} : vector<2x512xbf16>, vector<2x512xbf16>, vector<2x2xf32> -> vector<2x2xf32>
    %90 = vector.broadcast %81 : vector<1x2xf32> to vector<2x2xf32>
    %91 = arith.addf %89, %90 : vector<2x2xf32>
    %c0_26 = arith.constant 0 : index
    %c0_27 = arith.constant 0 : index
    %92 = vector.load %arg3[%c0_26, %c0_27] : memref<2x2xf32, #tpu.memory_space<vmem>>, vector<2x2xf32>
    tpu.vector_store %arg3[%c0_26, %c0_27], %91 {strides = array<i32>} : memref<2x2xf32, #tpu.memory_space<vmem>>, vector<2x2xf32>,
    return
  }
}

</mosaic_0001>

<bundles_post_ra>
// kernel: tpu_custom_call.1
= control target key start
LH: loop header
LB: loop body
LE: loop exit
PB: predicated region body
PF: predicated region fallthrough
CT: control target
= control target key end

     0   :  { %8 = vsyncpa [#allocation3], 0  ;;  %s1120_s0 = inlined_call_operand.hbm [shape: f32[40,128], index: 0, kind: input, shape index: {}]   ;;  %s1121_s1 = inlined_call_operand.hbm [shape: f32[120,128], index: 1, kind: input, shape index: {}]   ;;  %s1122_s2 = inlined_call_operand.hbm [shape: f32[56,512], index: 2, kind: input, shape index: {}]   ;;  %s1123_s3 = inlined_call_operand.hbm [shape: f32[2,2], index: 3, kind: output, shape index: {}]  }
   0x1   :  { %9 = vsyncpa [#allocation6], 0 }
   0x2   :  { %10 = vsyncpa [#allocation4], 0  ;;  %s961_s12 = smov [#allocation5]   ;;  %s962_s14 = smov [#allocation2]  }
   0x3   :  { %s28_s13 = sshll.u32 %s961_s12, 4  ;;  %s16_s15 = sshll.u32 %s962_s14, 4  ;;  %s29_s13 = int_to_ptr.vmem [resolvable:$true] %s28_s13  ;;  %s995_s15 = int_to_ptr.vmem [resolvable:$true] %s16_s15 }
   0x4   :  { %s867_s18 = scalar_lea.hbm %s1121_s1, 1920 }
   0x5   :  { %p868_p0 = scmp.ne.s32.totalorder %s1121_s1, %s867_s18  ;;  %p871_p1 = scmp.lt.u32.totalorder %s867_s18, %s1121_s1 }
   0x7   :  { %p873_p2 = pnand %p871_p1, %p868_p0 }
   0x9   :  { %876 = shalt.err (!%p873_p2)
}
   0xa   :  { %s877_s23 = scalar_lea.vmem %s29_s13, 1920  ;;  %p882_p4 = scmp.lt.s32.totalorder %s29_s13, %s29_s13 }
   0xb   :  { %p878_p3 = scmp.ne.s32.totalorder %s29_s13, %s877_s23  ;;  %p883_p5 = scmp.lt.s32.totalorder %s877_s23, %s877_s23 }
   0xd   :  { %p884_p6 = por %p883_p5, %p882_p4 }
   0xf   :  { %p885_p7 = pnand %p884_p6, %p878_p3 }
  0x11   :  { %888 = shalt.err (!%p885_p7)
}
  0x12   :  { %s963_s24 = smov 128   ;;  %s964_s25 = smov 8  }
  0x13   :  { %34 = dma.hbm_to_vmem [thread:$0]  %s1121_s1, 1920, %s29_s13, [#allocation6], %s963_s24, %s963_s24, %s964_s25  }
  0x14   :  { %s889_s30 = scalar_lea.hbm %s1120_s0, 640 }
  0x15   :  { %p890_p8 = scmp.ne.s32.totalorder %s1120_s0, %s889_s30  ;;  %p893_p9 = scmp.lt.u32.totalorder %s889_s30, %s1120_s0 }
  0x17   :  { %p895_p10 = pnand %p893_p9, %p890_p8 }
  0x19   :  { %898 = shalt.err (!%p895_p10)
}
  0x1a   :  { %s899_s8 = scalar_lea.vmem %s995_s15, 640  ;;  %p904_p12 = scmp.lt.s32.totalorder %s995_s15, %s995_s15 }
  0x1b   :  { %p900_p11 = scmp.ne.s32.totalorder %s995_s15, %s899_s8  ;;  %p905_p13 = scmp.lt.s32.totalorder %s899_s8, %s899_s8 }
  0x1d   :  { %p906_p0 = por %p905_p13, %p904_p12 }
  0x1f   :  { %p907_p1 = pnand %p906_p0, %p900_p11 }
  0x21   :  { %910 = shalt.err (!%p907_p1)
}
  0x22   :  { %22 = dma.hbm_to_vmem [thread:$0]  %s1120_s0, 640, %s995_s15, [#allocation3], %s963_s24, %s963_s24, %s964_s25  }
  0x23   :  { %s965_s10 = smov [#allocation7]   ;;  %s911_s14 = scalar_lea.hbm %s1122_s2, 3584 }
  0x24   :  { %s40_s11 = sshll.u32 %s965_s10, 4  ;;  %p912_p2 = scmp.ne.s32.totalorder %s1122_s2, %s911_s14  ;;  %s41_s11 = int_to_ptr.vmem [resolvable:$true] %s40_s11 }
  0x25   :  { %p915_p3 = scmp.lt.u32.totalorder %s911_s14, %s1122_s2 }
  0x27   :  { %p917_p4 = pnand %p915_p3, %p912_p2 }
  0x29   :  { %920 = shalt.err (!%p917_p4)
}
  0x2a   :  { %s921_s20 = scalar_lea.vmem %s41_s11, 3584  ;;  %p926_p6 = scmp.lt.s32.totalorder %s41_s11, %s41_s11 }
  0x2b   :  { %p922_p5 = scmp.ne.s32.totalorder %s41_s11, %s921_s20  ;;  %p927_p7 = scmp.lt.s32.totalorder %s921_s20, %s921_s20 }
  0x2d   :  { %p928_p8 = por %p927_p7, %p926_p6 }
  0x2f   :  { %p929_p9 = pnand %p928_p8, %p922_p5 }
  0x31   :  { %932 = shalt.err (!%p929_p9)
}
  0x32   :  { %s966_s0 = smov 512   ;;  %s967_s15 = smov 32  }
  0x33   :  { %46 = dma.hbm_to_vmem [thread:$0]  %s1122_s2, 3584, %s41_s11, [#allocation6], %s966_s0, %s966_s0, %s967_s15  }
  0x34   :  { %955 = dma.done.wait [#allocation3], 640  }
  0x35   :  { %956 = vsyncadd [#allocation3], 4294966656 }
  0x36   :  { %957 = dma.done.wait [#allocation6], 5504  }
  0x37   :  { %958 = vsyncadd [#allocation6], 4294961792  ;;  %v968_v0 = vmov 0.0   ;;  %vm969_vm0 = vmmov 0   ;;  %v65_v1 = vld [vmem:[#allocation5] sm:$0xff]  ;;  %v66_v2 = vld [vmem:[#allocation5 + $0x8] sm:$0xff]  ;;  %v154_v23 = vlaneseq }
  0x38   :  { %792 = vmatprep.subr.bf16.mxu0 %v968_v0  ;;  %800 = vmatprep.mubr.msk.bf16.mxu0 %vm969_vm0, %v968_v0  ;;  %v67_v3 = vld [vmem:[#allocation5 + $0x10] sm:$0xff]  ;;  %v73_v4 = vpack.c.bf16 %v66_v2, %v65_v1  ;;  %v68_v5 = vld [vmem:[#allocation5 + $0x18] sm:$0xff]  ;;  %v69_v7 = vld [vmem:[#allocation5 + $0x20] sm:$0xff]  ;;  %vm82_vm1 = vcmask 523264   ;;  %v970_v21 = vmov 1966171168  }
  0x39   :  { %v74_v6 = vpack.c.bf16 %v68_v5, %v67_v3  ;;  %v70_v8 = vld [vmem:[#allocation5 + $0x28] sm:$0xff]  ;;  %v71_v10 = vld [vmem:[#allocation5 + $0x30] sm:$0xff]  ;;  %v72_v11 = vld [vmem:[#allocation5 + $0x38] sm:$0xff]  ;;  %v152_v22 = vunpack.c.l.s4 %v970_v21  ;;  %v1055_v25 = vshrl.u32 %v154_v23, 7  ;;  %s971_s2 = smov 64   ;;  %vm215_vm2 = vcmask 261120  }
  0x3a   :  { %793 = vmatpush3.bf16.msra.mxu0 %v73_v4  ;;  %v75_v9 = vpack.c.bf16 %v70_v8, %v69_v7  ;;  %v76_v12 = vpack.c.bf16 %v72_v11, %v71_v10  ;;  %v1044_v13 = vld [vmem:[#allocation2] sm:$0xff]  ;;  %v58_v14 = vld [vmem:[#allocation2 + $0x8] sm:$0xff]  ;;  %v1050_v16 = vld [vmem:[#allocation2 + $0x10] sm:$0xff]  ;;  %s972_s23 = smov 96   ;;  %vm337_vm3 = vcmask 1043456   ;;  %vm274_vm4 = vcmask 64512  }
  0x3b   :  { %794 = vmatprep.subr.bf16.mxu0 %v968_v0  ;;  %v62_v15 = vpack.c.bf16 %v58_v14, %v1044_v13  ;;  %v60_v17 = vld [vmem:[#allocation2 + $0x18] sm:$0xff]  ;;  %v61_v19 = vld [vmem:[#allocation2 + $0x20] sm:$0xff]  ;;  %v153_v24 = vunpack.c.0.s8 %v152_v22  ;;  %v764_v26 = vld [vmem:[#allocation5 + $0x68] ss:$0 sm:$0xff]  ;;  %v1059_v34 = vsub.s32 0, %v1055_v25  ;;  %vm440_vm5 = vcmask 1041409  }
  0x3c   :  { %v63_v18 = vpack.c.bf16 %v60_v17, %v1050_v16  ;;  %v64_v20 = vpack.c.bf16 %v61_v19, %v61_v19  ;;  %v148_v50 = vld [vmem:[#allocation5 + $0x60] sm:$0xff]  ;;  %vm491_vm6 = vcmask 254976   ;;  %s974_s24 = smov [#allocation8]   ;;  %vm746_vm7 = vcmask 9216  }
  0x3d   :  { %v156_v27 = vsub.s32 %v153_v24, %v1055_v25  ;;  %v149_v51 = vpack.c.bf16 %v148_v50, %v148_v50  ;;  %s754_s25 = sshll.u32 %s974_s24, 4  ;;  %s755_s25 = int_to_ptr.vmem [resolvable:$true] %s754_s25 }
  0x3e   :  { %795 = vmatpush3.bf16.msra.mxu0 %v74_v6  ;;  %s933_s26 = scalar_lea.vmem %s755_s25, 32  ;;  %p938_p11 = scmp.lt.s32.totalorder %s755_s25, %s755_s25 }
  0x3f   :  { %796 = vmatprep.subr.bf16.mxu0 %v968_v0  ;;  %837 = vmatprep.subr.msk.bf16.mxu1 %vm215_vm2, %v149_v51  ;;  %v223_v53 = vsel %vm215_vm2, %v149_v51, 0  ;;  %v338_v2 = vsel %vm337_vm3, %v149_v51, 0  ;;  %p934_p10 = scmp.ne.s32.totalorder %s755_s25, %s933_s26  ;;  %p939_p12 = scmp.lt.s32.totalorder %s933_s26, %s933_s26 }
  0x40   :  { %813 = vmatpush3.bf16.xpose.msra.mxu1 %v223_v53 }
  0x41   :  { %838 = vmatprep.subr.msk.bf16.mxu1 %vm337_vm3, %v149_v51  ;;  %p940_p13 = por %p939_p12, %p938_p11 }
  0x42   :  { %797 = vmatpush3.bf16.msra.mxu0 %v75_v9 }
  0x43   :  { %798 = vmatprep.subr.bf16.mxu0 %v968_v0  ;;  %p941_p0 = pnand %p940_p13, %p934_p10 }
  0x46   :  { %799 = vmatpush3.bf16.msra.mxu0 %v76_v12 }
  0x49   :  { %801 = vmatmul.mubr.msk.bf16.vlgmr.msra.gmra.mrb[0].mxu0 %vm82_vm1, %v62_v15 }
  0x4a   :  { %804 = vmatprep.mubr.msk.bf16.mxu0 %vm969_vm0, %v968_v0 }
  0x51   :  { %805 = vmatmul.mubr.msk.bf16.gmra.mrb[4].mxu0 %vm82_vm1, %v63_v18 }
  0x52   :  { %808 = vmatprep.mubr.msk.bf16.mxu0 %vm969_vm0, %v968_v0 }
  0x59   :  { %809 = vmatmul.mubr.msk.bf16.gmra.mrb[8].mxu0 %vm82_vm1, %v64_v20 }
 0x11c   :  { %v126_v28 = vpop.f32.mrb[0].mxu0 }
 0x11d   :  { %v127_v29 = vadd.f32 %v764_v26, %v126_v28  ;;  %v802_v30 = vpop.f32.mrb[1].mxu0 }
 0x11e   :  { %v129_v31 = vpop.f32.mrb[2].mxu0 }
 0x11f   :  { %v157_v32 = vrot.slane %v127_v29, %v156_v27  ;;  %v803_v33 = vpop.f32.mrb[3].mxu0  ;;  %v130_v52 = vadd.f32 %v764_v26, %v129_v31 }
 0x121   :  { %v158_v35 = vcombine.high %v157_v32, %v157_v32  ;;  %v165_v36 = vrot.slane %v157_v32, %v156_v27 }
 0x123   :  { %v176_v37 = vrot.slane %v165_v36, %v1059_v34  ;;  %v172_v38 = vrot.slane %v158_v35, %v156_v27 }
 0x124   :  { %v134_v39 = vpop.f32.mrb[4].mxu0 }
 0x125   :  { %181 = vrot.lane.b32.xlu0 %v176_v37, %s967_s15  ;;  %v135_v40 = vadd.f32 %v764_v26, %v134_v39  ;;  %v806_v41 = vpop.f32.mrb[5].mxu0  ;;  %v180_v43 = vrot.slane %v172_v38, %v1059_v34 }
 0x126   :  { %v137_v42 = vpop.f32.mrb[6].mxu0 }
 0x127   :  { %v807_v44 = vpop.f32.mrb[7].mxu0  ;;  %v138_v54 = vadd.f32 %v764_v26, %v137_v42 }
 0x129   :  { %183 = vrot.lane.b32.xlu0 %v180_v43, %s967_s15 }
 0x12c   :  { %v142_v45 = vpop.f32.mrb[8].mxu0 }
 0x12d   :  { %203 = vrot.lane.b32.xlu0 %v58_v14, %s971_s2  ;;  %v143_v46 = vadd.f32 %v764_v26, %v142_v45  ;;  %v810_v47 = vpop.f32.mrb[9].mxu0 }
 0x12e   :  { %v145_v48 = vpop.f32.mrb[10].mxu0 }
 0x12f   :  { %v811_v49 = vpop.f32.mrb[11].mxu0 }
 0x131   :  { %207 = vrot.lane.b32.xlu0 %v60_v17, %s971_s2 }
 0x135   :  { %393 = vrot.lane.b32.xlu0 %v130_v52, %s971_s2 }
 0x139   :  { %397 = vrot.lane.b32.xlu0 %v138_v54, %s971_s2 }
 0x13d   :  { %444 = vrot.lane.b32.xlu0 %v764_v26, %s967_s15 }
 0x197   :  { %v182_v55 = vpop.permute.xlu0 %181 }
 0x198   :  { %v187_v56 = vmul.f32 %v182_v55, %v130_v52  ;;  %v188_v57 = vmul.f32 %v182_v55, %v135_v40 }
 0x19a   :  { %v191_v58 = vpack.c.bf16 %v188_v57, %v187_v56 }
 0x19b   :  { %v184_v59 = vpop.permute.xlu0 %183 }
 0x19c   :  { %v189_v60 = vmul.f32 %v184_v59, %v138_v54  ;;  %v190_v61 = vmul.f32 %v184_v59, %v143_v46  ;;  %195 = vrot.lane.b32.xlu1 %v191_v58, %s972_s23 }
 0x19e   :  { %v192_v62 = vpack.c.bf16 %v190_v61, %v189_v60 }
 0x19f   :  { %v204_v3 = vpop.permute.xlu0 %203 }
 0x1a0   :  { %197 = vrot.lane.b32.xlu1 %v192_v62, %s972_s23 }
 0x1a3   :  { %v208_v5 = vpop.permute.xlu0 %207 }
 0x1a4   :  { %205 = vrot.lane.b32.xlu1 %v1050_v16, %s971_s2 }
 0x1a8   :  { %209 = vrot.lane.b32.xlu1 %v61_v19, %s971_s2 }
 0x1ac   :  { %395 = vrot.lane.b32.xlu1 %v135_v40, %s971_s2 }
 0x1b0   :  { %399 = vrot.lane.b32.xlu1 %v143_v46, %s971_s2 }
 0x20e   :  { %v196_v63 = vpop.permute.xlu1 %195 }
 0x20f   :  { %814 = vmatprep.mubr.msk.bf16.mxu1 %vm215_vm2, %v196_v63 }
 0x212   :  { %v198_v1 = vpop.permute.xlu1 %197 }
 0x213   :  { %815 = vmatmul.mubr.msk.bf16.vlgmr.msra.gmra.mrb[0].mxu1 %vm215_vm2, %v198_v1 }
 0x214   :  { %819 = vmatpush3.bf16.msra.mxu1 %v338_v2 }
 0x215   :  { %824 = vmatprep.subr.bf16.mxu1 %v968_v0 }
 0x216   :  { %v206_v4 = vpop.permute.xlu1 %205 }
 0x21a   :  { %v210_v9 = vpop.permute.xlu1 %209 }
 0x2e6   :  { %v816_v6 = vpop.f32.mrb[0].mxu1 }
 0x2e7   :  { %v268_v7 = vadd.f32 %v816_v6, %v208_v5  ;;  %v259_v8 = vpop.f32.mrb[1].mxu1 }
 0x2e8   :  { %v260_v10 = vadd.f32 %v259_v8, %v204_v3  ;;  %v817_v11 = vpop.f32.mrb[2].mxu1 }
 0x2e9   :  { %v271_v12 = vadd.f32 %v817_v11, %v210_v9  ;;  %v262_v14 = vpop.f32.mrb[3].mxu1  ;;  %v284_v16 = vsel %vm274_vm4, %v268_v7, -inf  ;;  %v427_v11 = vld [vmem:[#allocation5 + $0x40] sm:$0xff] }
 0x2ea   :  { %v263_v15 = vadd.f32 %v262_v14, %v206_v4  ;;  %v275_v18 = vsel %vm274_vm4, %v260_v10, -inf }
 0x2eb   :  { %v285_v17 = vsel %vm274_vm4, %v271_v12, -inf }
 0x2ec   :  { %v286_v19 = vmax.f32 %v284_v16, %v285_v17  ;;  %v276_v20 = vsel %vm274_vm4, %v263_v15, -inf  ;;  %v430_v16 = vld [vmem:[#allocation5 + $0x58] sm:$0xff] }
 0x2ed   :  { %v277_v21 = vmax.f32 %v275_v18, %v276_v20  ;;  %v394_v18 = vpop.permute.xlu0 %393 }
 0x2ee   :  { %v287_v22 = vrot.slane %v286_v19, 4 }
 0x2ef   :  { %v278_v23 = vrot.slane %v277_v21, 4 }
 0x2f0   :  { %v288_v24 = vmax.f32 %v286_v19, %v287_v22  ;;  %v396_v19 = vpop.permute.xlu1 %395 }
 0x2f1   :  { %v279_v26 = vmax.f32 %v277_v21, %v278_v23  ;;  %v398_v20 = vpop.permute.xlu0 %397 }
 0x2f2   :  { %v289_v27 = vrot.slane %v288_v24, 2 }
 0x2f3   :  { %v280_v28 = vrot.slane %v279_v26, 2 }
 0x2f4   :  { %v290_v29 = vmax.f32 %v288_v24, %v289_v27  ;;  %v400_v24 = vpop.permute.xlu1 %399 }
 0x2f5   :  { %v281_v30 = vmax.f32 %v279_v26, %v280_v28 }
 0x2f6   :  { %v291_v31 = vrot.slane %v290_v29, 1 }
 0x2f7   :  { %v282_v32 = vrot.slane %v281_v30, 1 }
 0x2f8   :  { %v292_v33 = vmax.f32 %v290_v29, %v291_v31 }
 0x2f9   :  { %v283_v35 = vmax.f32 %v281_v30, %v282_v32 }
 0x2fa   :  { %v295_v36 = vsub.f32 %v268_v7, %v292_v33  ;;  %v296_v37 = vsub.f32 %v271_v12, %v292_v33  ;;  %v428_v12 = vld [vmem:[#allocation5 + $0x48] sm:$0xff] }
 0x2fb   :  { %v293_v38 = vsub.f32 %v260_v10, %v283_v35  ;;  %v294_v39 = vsub.f32 %v263_v15, %v283_v35  ;;  %v431_v14 = vpack.c.bf16 %v428_v12, %v427_v11  ;;  %v429_v15 = vld [vmem:[#allocation5 + $0x50] sm:$0xff]  ;;  %v517_v11 = vld [vmem:[#allocation7 + $0x8] sm:$0xff] }
 0x2fc   :  { %v301_v40 = vmul.f32 1.442695, %v295_v36  ;;  %v303_v41 = vmul.f32 1.442695, %v296_v37  ;;  %v432_v17 = vpack.c.bf16 %v430_v16, %v429_v15  ;;  %v521_v12 = vld [vmem:[#allocation7 + $0x28] sm:$0xff]  ;;  %v516_v16 = vld [vmem:[#allocation7] sm:$0xff] }
 0x2fd   :  { %v297_v42 = vmul.f32 1.442695, %v293_v38  ;;  %v299_v43 = vmul.f32 1.442695, %v294_v39  ;;  %v533_v15 = vpack.c.bf16 %v521_v12, %v517_v11 }
 0x2fe   :  { %853 = vpow2.f32 %v301_v40 }
 0x2ff   :  { %855 = vpow2.f32 %v303_v41 }
 0x300   :  { %857 = vpow2.f32 %v297_v42 }
 0x301   :  { %859 = vpow2.f32 %v299_v43 }
 0x308   :  { %v854_v44 = vpop.eup %853 }
 0x309   :  { %v856_v45 = vpop.eup %855  ;;  %v314_v46 = vsel %vm274_vm4, %v854_v44, 0.0 }
 0x30a   :  { %v858_v47 = vpop.eup %857  ;;  %v315_v48 = vsel %vm274_vm4, %v856_v45, 0.0 }
 0x30b   :  { %v860_v49 = vpop.eup %859  ;;  %v316_v50 = vadd.f32 %v315_v48, %v314_v46  ;;  %v305_v51 = vsel %vm274_vm4, %v858_v47, 0.0 }
 0x30c   :  { %v306_v52 = vsel %vm274_vm4, %v860_v49, 0.0 }
 0x30d   :  { %v317_v53 = vrot.slane %v316_v50, 4  ;;  %v307_v54 = vadd.f32 %v306_v52, %v305_v51 }
 0x30f   :  { %v318_v55 = vadd.f32 %v317_v53, %v316_v50  ;;  %v308_v56 = vrot.slane %v307_v54, 4 }
 0x311   :  { %v319_v57 = vrot.slane %v318_v55, 2  ;;  %v309_v58 = vadd.f32 %v308_v56, %v307_v54 }
 0x313   :  { %v320_v59 = vadd.f32 %v319_v57, %v318_v55  ;;  %v310_v60 = vrot.slane %v309_v58, 2  ;;  %v445_v55 = vpop.permute.xlu0 %444 }
 0x315   :  { %v321_v61 = vrot.slane %v320_v59, 1  ;;  %v311_v62 = vadd.f32 %v310_v60, %v309_v58 }
 0x317   :  { %v322_v63 = vadd.f32 %v321_v61, %v320_v59  ;;  %v312_v1 = vrot.slane %v311_v62, 1 }
 0x319   :  { %861 = vrcp.f32 %v322_v63  ;;  %v313_v2 = vadd.f32 %v312_v1, %v311_v62 }
 0x31b   :  { %863 = vrcp.f32 %v313_v2 }
 0x323   :  { %v862_v3 = vpop.eup %861 }
 0x324   :  { %v327_v4 = vmul.f32 %v862_v3, %v854_v44  ;;  %v328_v5 = vmul.f32 %v862_v3, %v856_v45 }
 0x325   :  { %v864_v6 = vpop.eup %863 }
 0x326   :  { %v325_v7 = vmul.f32 %v864_v6, %v858_v47  ;;  %v326_v8 = vmul.f32 %v864_v6, %v860_v49  ;;  %v330_v9 = vpack.c.bf16 %v328_v5, %v327_v4  ;;  %v773_v5 = vld [vmem:[#allocation5 + $0x70] ss:$0 sm:$0xff] }
 0x327   :  { %v519_v6 = vld [vmem:[#allocation7 + $0x18] sm:$0xff] }
 0x328   :  { %v329_v10 = vpack.c.bf16 %v326_v8, %v325_v7  ;;  %v523_v7 = vld [vmem:[#allocation7 + $0x38] sm:$0xff]  ;;  %v518_v8 = vld [vmem:[#allocation7 + $0x10] sm:$0xff] }
 0x32a   :  { %820 = vmatprep.mubr.msk.bf16.mxu1 %vm274_vm4, %v329_v10  ;;  %v522_v10 = vld [vmem:[#allocation7 + $0x30] sm:$0xff] }
 0x32b   :  { %821 = vmatmul.mubr.msk.bf16.vlgmr.msra.gmra.mrb[4].mxu1 %vm274_vm4, %v330_v9  ;;  %v535_v9 = vpack.c.bf16 %v523_v7, %v519_v6 }
 0x32c   :  { %828 = vmatprep.mubr.msk.bf16.mxu1 %vm969_vm0, %v968_v0  ;;  %825 = vmatpush3.bf16.msra.mxu1 %v431_v14  ;;  %v534_v14 = vpack.c.bf16 %v522_v10, %v518_v8 }
 0x32d   :  { %826 = vmatprep.subr.bf16.mxu1 %v968_v0  ;;  %617 = vmatprep.subr.bf16.mxu0 %v535_v9 }
 0x32e   :  { %618 = vmatpush1.bf16.msra.mxu0 %v534_v14  ;;  %v550_v14 = vld [vmem:[#allocation7 + $0xc0] ss:$0 sm:$0xff] }
 0x330   :  { %827 = vmatpush3.bf16.msra.mxu1 %v432_v17  ;;  %v525_v17 = vld [vmem:[#allocation7 + $0x48] sm:$0xff] }
 0x331   :  { %576 = vmatprep.subr.bf16.mxu1 %v533_v15 }
 0x3fe   :  { %v822_v21 = vpop.f32.mrb[4].mxu1 }
 0x3ff   :  { %v407_v22 = vmul.f32 %v822_v21, %v398_v20  ;;  %v374_v23 = vpop.f32.mrb[5].mxu1  ;;  %v527_v21 = vld [vmem:[#allocation7 + $0x58] sm:$0xff] }
 0x400   :  { %v405_v26 = vmul.f32 %v394_v18, %v374_v23  ;;  %v823_v27 = vpop.f32.mrb[6].mxu1  ;;  %v524_v23 = vld [vmem:[#allocation7 + $0x40] sm:$0xff] }
 0x401   :  { %v408_v28 = vmul.f32 %v823_v27, %v400_v24  ;;  %v377_v29 = vpop.f32.mrb[7].mxu1  ;;  %v418_v31 = vsel %vm215_vm2, %v407_v22, 0.0  ;;  %v531_v22 = vld [vmem:[#allocation7 + $0x78] sm:$0xff]  ;;  %v528_v24 = vld [vmem:[#allocation7 + $0x60] sm:$0xff]  ;;  %v526_v27 = vld [vmem:[#allocation7 + $0x50] sm:$0xff] }
 0x402   :  { %v406_v30 = vmul.f32 %v396_v19, %v377_v29  ;;  %v409_v32 = vsel %vm215_vm2, %v405_v26, 0.0  ;;  %v529_v19 = vld [vmem:[#allocation7 + $0x68] sm:$0xff]  ;;  %v539_v26 = vpack.c.bf16 %v531_v22, %v527_v21  ;;  %v530_v29 = vld [vmem:[#allocation7 + $0x70] sm:$0xff] }
 0x403   :  { %v419_v0 = vsel %vm215_vm2, %v408_v28, 0.0  ;;  %v537_v20 = vpack.c.bf16 %v529_v19, %v525_v17  ;;  %v536_v28 = vpack.c.bf16 %v528_v24, %v524_v23 }
 0x404   :  { %v420_v33 = vadd.f32 %v419_v0, %v418_v31  ;;  %v410_v35 = vsel %vm215_vm2, %v406_v30, 0.0  ;;  %619 = vmatprep.subr.bf16.mxu0 %v539_v26  ;;  %v538_v30 = vpack.c.bf16 %v530_v29, %v526_v27  ;;  %v973_v31 = vmov 0  }
 0x405   :  { %v411_v36 = vadd.f32 %v410_v35, %v409_v32  ;;  %649 = vmatprep.mubr.bf16.mxu0 %v973_v31 }
 0x406   :  { %v421_v37 = vrot.slane %v420_v33, 4  ;;  %620 = vmatpush1.bf16.msra.mxu0 %v538_v30 }
 0x407   :  { %v412_v38 = vrot.slane %v411_v36, 4 }
 0x408   :  { %v422_v39 = vadd.f32 %v421_v37, %v420_v33 }
 0x409   :  { %v413_v40 = vadd.f32 %v412_v38, %v411_v36 }
 0x40a   :  { %v423_v41 = vrot.slane %v422_v39, 2 }
 0x40b   :  { %v414_v42 = vrot.slane %v413_v40, 2 }
 0x40c   :  { %v424_v43 = vadd.f32 %v423_v41, %v422_v39  ;;  %v543_v41 = vld [vmem:[#allocation7 + $0xa8] sm:$0x3] }
 0x40d   :  { %v415_v44 = vadd.f32 %v414_v42, %v413_v40  ;;  %v547_v42 = vpack.c.bf16 %v543_v41, %v543_v41 }
 0x40e   :  { %v425_v45 = vrot.slane %v424_v43, 1 }
 0x40f   :  { %v416_v46 = vrot.slane %v415_v44, 1 }
 0x410   :  { %v426_v47 = vadd.f32 %v425_v45, %v424_v43  ;;  %v542_v43 = vld [vmem:[#allocation7 + $0xa0] sm:$0x3]  ;;  %v545_v45 = vld [vmem:[#allocation7 + $0xb8] sm:$0x3] }
 0x411   :  { %v417_v48 = vadd.f32 %v416_v46, %v415_v44  ;;  %v546_v44 = vpack.c.bf16 %v542_v43, %v542_v43  ;;  %v549_v46 = vpack.c.bf16 %v545_v45, %v545_v45 }
 0x412   :  { %v435_v49 = vpack.c.bf16 %v426_v47, %v426_v47  ;;  %v541_v47 = vld [vmem:[#allocation7 + $0x80] ss:$8 sm:$0xf] }
 0x413   :  { %v434_v50 = vpack.c.bf16 %v417_v48, %v417_v48  ;;  %v559_v48 = vsub.s32 1, %v1055_v25 }
 0x414   :  { %v439_v51 = vunpack.c.l.b16 %v435_v49  ;;  %v567_v49 = vsub.s32 3, %v1055_v25 }
 0x415   :  { %v438_v52 = vunpack.c.l.b16 %v434_v50  ;;  %v556_v50 = vrot.slane %v541_v47, %v1059_v34 }
 0x417   :  { %v441_v53 = vsel %vm440_vm5, %v439_v51, %v438_v52  ;;  %v560_v51 = vrot.slane %v541_v47, %v559_v48  ;;  %v568_v52 = vrot.slane %v541_v47, %v567_v49 }
 0x418   :  { %v442_v54 = vpack.c.b16 %v441_v53, %v441_v53 }
 0x41a   :  { %829 = vmatmul.mubr.msk.bf16.vlgmr.msra.gmra.mrb[8].mxu1 %vm215_vm2, %v442_v54 }
 0x41b   :  { %608 = vmatprep.mubr.bf16.mxu1 %v973_v31 }
 0x4ed   :  { %v484_v56 = vpop.f32.mrb[8].mxu1 }
 0x4ee   :  { %v485_v57 = vadd.f32 %v484_v56, %v445_v55  ;;  %v830_v58 = vpop.f32.mrb[9].mxu1 }
 0x4ef   :  { %v487_v59 = vpop.f32.mrb[10].mxu1 }
 0x4f0   :  { %v831_v60 = vpop.f32.mrb[11].mxu1  ;;  %v490_v61 = vadd.f32 %v485_v57, %v1044_v13  ;;  %v520_v13 = vld [vmem:[#allocation7 + $0x20] sm:$0xff] }
 0x4f1   :  { %v532_v18 = vpack.c.bf16 %v520_v13, %v516_v16 }
 0x4f2   :  { %v492_v62 = vsel %vm491_vm6, %v490_v61, 0.0 }
 0x4f3   :  { %493 = vadd.xlane.f32.xlu1 %v492_v62  ;;  %577 = vmatpush1.bf16.msra.mxu1 %v532_v18 }
 0x4f4   :  { %578 = vmatprep.subr.bf16.mxu1 %v537_v20 }
 0x4f7   :  { %579 = vmatpush1.bf16.msra.mxu1 %v536_v28 }
 0x4f8   :  { %666 = vmatprep.subr.bf16.mxu1 %v547_v42 }
 0x580   :  { %v494_v63 = vpop.xlane.xlu1 %493 }
 0x581   :  { %v496_v1 = vmul.f32 0.03125, %v494_v63  ;;  %v563_v63 = vsub.s32 2, %v1055_v25 }
 0x583   :  { %v497_v2 = vsub.f32 %v490_v61, %v496_v1  ;;  %v564_v8 = vrot.slane %v541_v47, %v563_v63 }
 0x585   :  { %v498_v3 = vmul.f32 %v497_v2, %v497_v2 }
 0x587   :  { %v499_v4 = vsel %vm491_vm6, %v498_v3, 0.0  ;;  %v544_v3 = vld [vmem:[#allocation7 + $0xb0] sm:$0x3] }
 0x588   :  { %500 = vadd.xlane.f32.xlu0 %v499_v4  ;;  %v548_v6 = vpack.c.bf16 %v544_v3, %v544_v3 }
 0x59e   :  { %512 = vrot.lane.b32.xlu0 %v773_v5, %s972_s23 }
 0x615   :  { %v501_v0 = vpop.xlane.xlu0 %500 }
 0x616   :  { %v502_v32 = vmul.f32 0.03125, %v501_v0 }
 0x618   :  { %v503_v33 = vadd.f32 1e-05, %v502_v32 }
 0x619   :  { %v513_v37 = vpop.permute.xlu0 %512 }
 0x61a   :  { %865 = vrsqrt.f32 %v503_v33 }
 0x624   :  { %v866_v35 = vpop.eup %865 }
 0x625   :  { %v505_v36 = vmul.f32 %v866_v35, %v497_v2 }
 0x627   :  { %v510_v38 = vmul.f32 %v773_v5, %v505_v36 }
 0x629   :  { %v515_v39 = vadd.f32 %v513_v37, %v510_v38 }
 0x62b   :  { %v551_v40 = vpack.c.bf16 %v515_v39, %v515_v39 }
 0x62d   :  { %774 = vmatmul.mubr.msk.bf16.vlgmr.msra.gmra.mrb[12].mxu1 %vm215_vm2, %v551_v40  ;;  %775 = vmatmul.mubr.msk.bf16.vlgmr.msra.gmra.mrb[12].mxu0 %vm215_vm2, %v551_v40 }
 0x62e   :  { %667 = vmatpush1.bf16.xpose.msra.mxu1 %v546_v44 }
 0x62f   :  { %706 = vmatprep.subr.bf16.mxu1 %v549_v46 }
 0x700   :  { %v610_v53 = vpop.f32.mrb[12].mxu1  ;;  %v651_v54 = vpop.f32.mrb[12].mxu0 }
 0x701   :  { %v611_v55 = vadd.f32 %v610_v53, %v556_v50  ;;  %v612_v56 = vpop.f32.mrb[13].mxu1  ;;  %v653_v57 = vpop.f32.mrb[13].mxu0  ;;  %v652_v10 = vadd.f32 %v651_v54, %v564_v8 }
 0x702   :  { %v613_v58 = vadd.f32 %v612_v56, %v560_v51  ;;  %v654_v59 = vadd.f32 %v653_v57, %v568_v52  ;;  %v614_v60 = vpop.f32.mrb[14].mxu1  ;;  %v655_v61 = vpop.f32.mrb[14].mxu0 }
 0x703   :  { %v658_v62 = vmax.f32 %v611_v55, 0.0  ;;  %v615_v1 = vpop.f32.mrb[15].mxu1  ;;  %v656_v2 = vpop.f32.mrb[15].mxu0  ;;  %v660_v11 = vmax.f32 %v652_v10, 0.0 }
 0x704   :  { %v659_v4 = vmax.f32 %v613_v58, 0.0  ;;  %v661_v5 = vmax.f32 %v654_v59, 0.0 }
 0x705   :  { %v662_v7 = vpack.c.bf16 %v658_v62, %v658_v62  ;;  %v664_v12 = vpack.c.bf16 %v660_v11, %v660_v11 }
 0x706   :  { %v663_v34 = vpack.c.bf16 %v659_v4, %v659_v4  ;;  %v665_v9 = vpack.c.bf16 %v661_v5, %v661_v5 }
 0x708   :  { %698 = vmatprep.mubr.bf16.mxu1 %v663_v34 }
 0x709   :  { %699 = vmatmul.mubr.bf16.vlgmr.msra.gmra.mrb[16].mxu1 %v662_v7 }
 0x70a   :  { %707 = vmatpush1.bf16.xpose.msra.mxu1 %v548_v6  ;;  %738 = vmatprep.mubr.bf16.mxu1 %v665_v9 }
 0x715   :  { %739 = vmatmul.mubr.bf16.vlgmr.msra.gmra.mrb[16].mxu1 %v664_v12 }
 0x7e8   :  { %v740_v25 = vpop.f32.mrb[16].mxu1 }
 0x7e9   :  { %v832_v15 = vadd.f32 %v740_v25, %v550_v14  ;;  %v742_v16 = vpop.f32.mrb[17].mxu1 }
 0x7ea   :  { %v743_v13 = vpop.f32.mrb[18].mxu1 }
 0x7eb   :  { %v744_v17 = vpop.f32.mrb[19].mxu1  ;;  %747 = vst.msk [vmem:[#allocation8] sm:$0x3] %vm746_vm7, %v832_v15 }
 0x7ec   :  { %944 = shalt.err (!%p941_p0)
}
 0x7ed   :  { %s945_s29 = scalar_lea.hbm %s1123_s3, 32 }
 0x7ee   :  { %p946_p1 = scmp.ne.s32.totalorder %s1123_s3, %s945_s29  ;;  %p949_p2 = scmp.lt.u32.totalorder %s945_s29, %s1123_s3 }
 0x7f0   :  { %p951_p3 = pnand %p949_p2, %p946_p1 }
 0x7f2   :  { %954 = shalt.err (!%p951_p3)
}
 0x7f3   :  { %757 = dma.vmem_to_hbm [thread:$0]  %s755_s25, 32, %s1123_s3, [#allocation4]  }
 0x7f4   :  { %959 = dma.done.wait [#allocation4], 32  }
 0x7f5   :  { %960 = vsyncadd [#allocation4], 4294967264 }
 0x7f6   :  { %761 = vsyncpa [#allocation3], 1 }
 0x7f7   :  { %762 = vsyncpa [#allocation6], 1 }
 0x7f8   :  { %763 = vsyncpa [#allocation4], 1 }

</bundles_post_ra>
